<compile_context>
chip_gen: v7x
topology: tpu7x:2x2x1
jax: 0.10.0
libtpu: 0.0.40
codegen_flags: <defaults>
</compile_context>

<pallas_src>
import math

import jax
import jax.numpy as jnp
from jax.experimental import pallas as pl
from jax.experimental.pallas import tpu as pltpu

INPUT_DIM = 32   # "input_dim = X.shape[1]" in the reference script
H1, H2, H3, OUT = 256, 128, 64, 1


def _round_up(n, m):
    return ((n + m - 1) // m) * m


def mlp_kernel(x_ref, w1_ref, b1_ref, w2_ref, b2_ref,
               w3_ref, b3_ref, w4_ref, b4_ref, o_ref):
    # x arrives as f32; cast to bf16 in-kernel (MXU operand).  Weights are
    # pre-cast bf16; biases stay f32; all matmuls accumulate in f32; the
    # elementwise tail (bias add, ReLU) runs in f32 (portable to v5e).
    x = x_ref[...].astype(jnp.bfloat16)

    # fc1 + relu   (dropout(p=0.3) is identity at inference -> no-op)
    h = jnp.dot(x, w1_ref[...], preferred_element_type=jnp.float32) + b1_ref[...]
    h = jnp.maximum(h, 0.0)

    # fc2 + relu   (dropout no-op)
    h = jnp.dot(h.astype(jnp.bfloat16), w2_ref[...],
                preferred_element_type=jnp.float32) + b2_ref[...]
    h = jnp.maximum(h, 0.0)

    # fc3 + relu
    h = jnp.dot(h.astype(jnp.bfloat16), w3_ref[...],
                preferred_element_type=jnp.float32) + b3_ref[...]
    h = jnp.maximum(h, 0.0)

    # fc4 (N=1): VPU multiply + cross-lane reduce instead of a 1-column MXU
    # matmul.  w4_ref is the (1, 64) row form of the (64, 1) weight.
    o_ref[...] = jnp.sum(h * w4_ref[...], axis=-1, keepdims=True) + b4_ref[...]


def reference_forward(x, params):
    """Pure-f32 XLA reference (sanity checks only)."""
    (w1, b1), (w2, b2), (w3, b3), (w4, b4) = params
    h = jnp.maximum(x @ w1 + b1, 0.0)
    h = jnp.maximum(h @ w2 + b2, 0.0)
    h = jnp.maximum(h @ w3 + b3, 0.0)
    return h @ w4 + b4


def reference_forward_bf16(x, params):
    """Numerics-matching reference (bf16 matmul operands, f32 accumulate).

    Also used as the small-batch fallback so numerics are consistent across
    batch sizes.
    """
    (w1, b1), (w2, b2), (w3, b3), (w4, b4) = params
    xb = x.astype(jnp.bfloat16)
    h = jnp.dot(xb, w1.astype(jnp.bfloat16), preferred_element_type=jnp.float32) + b1
    h = jnp.maximum(h, 0.0)
    h = jnp.dot(h.astype(jnp.bfloat16), w2.astype(jnp.bfloat16),
                preferred_element_type=jnp.float32) + b2
    h = jnp.maximum(h, 0.0)
    h = jnp.dot(h.astype(jnp.bfloat16), w3.astype(jnp.bfloat16),
                preferred_element_type=jnp.float32) + b3
    h = jnp.maximum(h, 0.0)
    return jnp.sum(h * w4.reshape(1, H3), axis=-1, keepdims=True) + b4.reshape(1, OUT)


def house_price_forward(x, params, *, batch_tile=2048, min_pallas_batch=256):
    """x: (B, INPUT_DIM) f32 -> (B, 1) f32."""
    (w1, b1), (w2, b2), (w3, b3), (w4, b4) = params
    B, D = x.shape

    # For small batches the pallas_call launch + ~200 KB weight-DMA prologue
    # dominates; XLA's fused dot chain is competitive there.  Use the
    # numerics-matching bf16 reference so results agree across batch sizes.
    if B < min_pallas_batch:
        return reference_forward_bf16(x, params)

    # Tile selection: as large as possible (multiple of 8 sublanes, <= B so the
    # BlockSpec sublane rule is always satisfied), capped at batch_tile.
    # VMEM is not the constraint: weights ~200 KB + a (tile, 256) f32
    # intermediate is a few MB even at tile=2048.
    tile = max(8, min(batch_tile, (B // 8) * 8))
    # Ensure >= 2 grid steps for larger batches so the batch axis can shard
    # across v7x's two TensorCores (no-op on single-core v5e/v6e).
    if B >= 512:
        tile = min(tile, _round_up(pl.cdiv(B, 2), 8))

    grid = (pl.cdiv(B, tile),)   # last block may be partial: Pallas pads OOB
                                 # reads and drops OOB writes of the edge tile.

    # bf16 MXU weight operands; everything else f32.  x stays f32 (cast is
    # done in-kernel to avoid an extra wrapper-side HBM pass).
    w1b, w2b, w3b = (w.astype(jnp.bfloat16) for w in (w1, w2, w3))
    w4_row = w4.reshape(1, H3).astype(jnp.float32)   # used on the VPU, stays f32
    b1f, b2f, b3f = (b.astype(jnp.float32) for b in (b1, b2, b3))
    b4f = b4.reshape(1, OUT).astype(jnp.float32)

    # Grid-invariant operands: constant index map (Pallas re-uses the resident
    # copy; with ~200 KB of weights VMEM headroom is never the constraint).
    def const_spec(shape):
        return pl.BlockSpec(shape, lambda i: (0, 0))

    weight_bytes = (2 * (D * H1 + H1 * H2 + H2 * H3)      # bf16 weights
                    + 4 * (H3 + H1 + H2 + H3 + OUT))       # f32 w4 row + biases
    cost = pl.CostEstimate(
        flops=2 * B * (D * H1 + H1 * H2 + H2 * H3 + H3 * OUT),
        transcendentals=0,
        bytes_accessed=B * (D * 4 + OUT * 4) + weight_bytes,
    )

    out = pl.pallas_call(
        mlp_kernel,
        out_shape=jax.ShapeDtypeStruct((B, OUT), jnp.float32),
        grid_spec=pltpu.PrefetchScalarGridSpec(
            num_scalar_prefetch=0,
            grid=grid,
            in_specs=[
                pl.BlockSpec((tile, D), lambda i: (i, 0)),   # x tile (pipelined)
                const_spec((D, H1)),  const_spec((1, H1)),
                const_spec((H1, H2)), const_spec((1, H2)),
                const_spec((H2, H3)), const_spec((1, H3)),
                const_spec((1, H3)),  const_spec((1, OUT)),
            ],
            out_specs=pl.BlockSpec((tile, OUT), lambda i: (i, 0)),
        ),
        # Batch axis is embarrassingly parallel -> shards across the 2 TCs on
        # v7x whenever the grid has >= 2 steps.
        compiler_params=pltpu.CompilerParams(
            dimension_semantics=("parallel",)),
        cost_estimate=cost,
    )(x, w1b, b1f, w2b, b2f, w3b, b3f, w4_row, b4f)

    return out


def init_params(key):
    """Deterministic init mimicking nn.Linear's uniform(-1/sqrt(fan_in), ...)."""
    dims = [(INPUT_DIM, H1), (H1, H2), (H2, H3), (H3, OUT)]
    params = []
    for (fan_in, fan_out) in dims:
        key, kw, kb = jax.random.split(key, 3)
        bound = 1.0 / math.sqrt(fan_in)
        w = jax.random.uniform(kw, (fan_in, fan_out), jnp.float32, -bound, bound)
        b = jax.random.uniform(kb, (1, fan_out), jnp.float32, -bound, bound)
        params.append((w, b))
    return params


if __name__ == "__main__":
    key = jax.random.PRNGKey(0)
    key, kx = jax.random.split(key)

    # Small demo shapes; batch deliberately NOT a multiple of the tile so the
    # partial-edge-block path is exercised, and batch_tile=128 gives a 2-step
    # grid (exercises the pipelined / parallel grid).  min_pallas_batch is
    # lowered so the demo goes through the Pallas path rather than the XLA
    # fallback.
    batch = 200
    x = jax.random.normal(kx, (batch, INPUT_DIM), jnp.float32)
    params = init_params(key)

    out = house_price_forward(x, params, batch_tile=128, min_pallas_batch=64)
    out = jax.block_until_ready(out)
    assert out.shape == (batch, OUT)

    # Check against a reference using identical numerics (bf16 MXU operands,
    # f32 accumulate).
    ref_bf16 = reference_forward_bf16(x, params)
    assert jnp.allclose(out, ref_bf16, atol=1e-2, rtol=1e-2)

    # Loose sanity check against the pure-f32 reference.
    ref_f32 = reference_forward(x, params)
    assert jnp.allclose(out, ref_f32, atol=1e-1, rtol=1e-1)

    # Also exercise the small-batch XLA fallback path once.
    out_small = jax.block_until_ready(house_price_forward(x[:16], params))
    assert out_small.shape == (16, OUT)
    assert jnp.allclose(out_small, ref_bf16[:16], atol=1e-2, rtol=1e-2)

    print("KERNEL_OK")
</pallas_src>

<mosaic_0001>
module attributes {stable_mosaic.version = 11 : i64} {
  func.func @mlp_kernel(%arg0: i32, %arg1: memref<128x32xf32, #tpu.memory_space<vmem>>, %arg2: memref<32x256xbf16, #tpu.memory_space<vmem>>, %arg3: memref<1x256xf32, #tpu.memory_space<vmem>>, %arg4: memref<256x128xbf16, #tpu.memory_space<vmem>>, %arg5: memref<1x128xf32, #tpu.memory_space<vmem>>, %arg6: memref<128x64xbf16, #tpu.memory_space<vmem>>, %arg7: memref<1x64xf32, #tpu.memory_space<vmem>>, %arg8: memref<1x64xf32, #tpu.memory_space<vmem>>, %arg9: memref<1x1xf32, #tpu.memory_space<vmem>>, %arg10: memref<128x1xf32, #tpu.memory_space<vmem>>) attributes {dimension_semantics = [#tpu.dimension_semantics<parallel>], iteration_bounds = array<i64: 2>, scalar_prefetch = 0 : i64, scratch_operands = 0 : i64, tpu.core_type = #tpu.core_type<tc>, window_params = [{transform_indices = @transform_0, window_bounds = array<i64: 128, 32>}, {pipeline_mode = #tpu.pipeline_mode<synchronous>, transform_indices = @transform_1, window_bounds = array<i64: 32, 256>}, {pipeline_mode = #tpu.pipeline_mode<synchronous>, transform_indices = @transform_2, window_bounds = array<i64: 1, 256>}, {pipeline_mode = #tpu.pipeline_mode<synchronous>, transform_indices = @transform_3, window_bounds = array<i64: 256, 128>}, {pipeline_mode = #tpu.pipeline_mode<synchronous>, transform_indices = @transform_4, window_bounds = array<i64: 1, 128>}, {pipeline_mode = #tpu.pipeline_mode<synchronous>, transform_indices = @transform_5, window_bounds = array<i64: 128, 64>}, {pipeline_mode = #tpu.pipeline_mode<synchronous>, transform_indices = @transform_6, window_bounds = array<i64: 1, 64>}, {pipeline_mode = #tpu.pipeline_mode<synchronous>, transform_indices = @transform_7, window_bounds = array<i64: 1, 64>}, {pipeline_mode = #tpu.pipeline_mode<synchronous>, transform_indices = @transform_8, window_bounds = array<i64: 1, 1>}, {transform_indices = @transform_9, window_bounds = array<i64: 128, 1>}]} {
    %c0 = arith.constant 0 : index
    %c0_0 = arith.constant 0 : index
    %0 = vector.load %arg1[%c0, %c0_0] : memref<128x32xf32, #tpu.memory_space<vmem>>, vector<128x32xf32>
    %1 = arith.truncf %0 : vector<128x32xf32> to vector<128x32xbf16>
    %c0_1 = arith.constant 0 : index
    %c0_2 = arith.constant 0 : index
    %2 = vector.load %arg2[%c0_1, %c0_2] : memref<32x256xbf16, #tpu.memory_space<vmem>>, vector<32x256xbf16>
    %cst = arith.constant dense<0.000000e+00> : vector<128x256xf32>
    %3 = tpu.matmul %1, %2, %cst {dimension_numbers = #tpu.dot_dimension_numbers<[1], [0], [0], [1], [0, 0, 1, 1], [], []>} : vector<128x32xbf16>, vector<32x256xbf16>, vector<128x256xf32> -> vector<128x256xf32>
    %c0_3 = arith.constant 0 : index
    %c0_4 = arith.constant 0 : index
    %4 = vector.load %arg3[%c0_3, %c0_4] : memref<1x256xf32, #tpu.memory_space<vmem>>, vector<1x256xf32>
    %5 = vector.broadcast %4 : vector<1x256xf32> to vector<128x256xf32>
    %6 = arith.addf %3, %5 : vector<128x256xf32>
    %cst_5 = arith.constant 0.000000e+00 : f32
    %7 = vector.broadcast %cst_5 : f32 to vector<128x256xf32>
    %8 = arith.maximumf %6, %7 : vector<128x256xf32>
    %9 = arith.truncf %8 : vector<128x256xf32> to vector<128x256xbf16>
    %c0_6 = arith.constant 0 : index
    %c0_7 = arith.constant 0 : index
    %10 = vector.load %arg4[%c0_6, %c0_7] : memref<256x128xbf16, #tpu.memory_space<vmem>>, vector<256x128xbf16>
    %cst_8 = arith.constant dense<0.000000e+00> : vector<128x128xf32>
    %11 = tpu.matmul %9, %10, %cst_8 {dimension_numbers = #tpu.dot_dimension_numbers<[1], [0], [0], [1], [0, 0, 1, 1], [], []>} : vector<128x256xbf16>, vector<256x128xbf16>, vector<128x128xf32> -> vector<128x128xf32>
    %c0_9 = arith.constant 0 : index
    %c0_10 = arith.constant 0 : index
    %12 = vector.load %arg5[%c0_9, %c0_10] : memref<1x128xf32, #tpu.memory_space<vmem>>, vector<1x128xf32>
    %13 = vector.broadcast %12 : vector<1x128xf32> to vector<128x128xf32>
    %14 = arith.addf %11, %13 : vector<128x128xf32>
    %cst_11 = arith.constant 0.000000e+00 : f32
    %15 = vector.broadcast %cst_11 : f32 to vector<128x128xf32>
    %16 = arith.maximumf %14, %15 : vector<128x128xf32>
    %17 = arith.truncf %16 : vector<128x128xf32> to vector<128x128xbf16>
    %c0_12 = arith.constant 0 : index
    %c0_13 = arith.constant 0 : index
    %18 = vector.load %arg6[%c0_12, %c0_13] : memref<128x64xbf16, #tpu.memory_space<vmem>>, vector<128x64xbf16>
    %cst_14 = arith.constant dense<0.000000e+00> : vector<128x64xf32>
    %19 = tpu.matmul %17, %18, %cst_14 {dimension_numbers = #tpu.dot_dimension_numbers<[1], [0], [0], [1], [0, 0, 1, 1], [], []>} : vector<128x128xbf16>, vector<128x64xbf16>, vector<128x64xf32> -> vector<128x64xf32>
    %c0_15 = arith.constant 0 : index
    %c0_16 = arith.constant 0 : index
    %20 = vector.load %arg7[%c0_15, %c0_16] : memref<1x64xf32, #tpu.memory_space<vmem>>, vector<1x64xf32>
    %21 = vector.broadcast %20 : vector<1x64xf32> to vector<128x64xf32>
    %22 = arith.addf %19, %21 : vector<128x64xf32>
    %cst_17 = arith.constant 0.000000e+00 : f32
    %23 = vector.broadcast %cst_17 : f32 to vector<128x64xf32>
    %24 = arith.maximumf %22, %23 : vector<128x64xf32>
    %c0_18 = arith.constant 0 : index
    %c0_19 = arith.constant 0 : index
    %25 = vector.load %arg8[%c0_18, %c0_19] : memref<1x64xf32, #tpu.memory_space<vmem>>, vector<1x64xf32>
    %26 = vector.broadcast %25 : vector<1x64xf32> to vector<128x64xf32>
    %27 = arith.mulf %24, %26 : vector<128x64xf32>
    %cst_20 = arith.constant dense<0.000000e+00> : vector<128xf32>
    %28 = vector.multi_reduction <add>, %27, %cst_20 [1] : vector<128x64xf32> to vector<128xf32>
    %29 = vector.shape_cast %28 : vector<128xf32> to vector<128x1xf32>
    %c0_21 = arith.constant 0 : index
    %c0_22 = arith.constant 0 : index
    %30 = vector.load %arg9[%c0_21, %c0_22] : memref<1x1xf32, #tpu.memory_space<vmem>>, vector<1x1xf32>
    %31 = vector.broadcast %30 : vector<1x1xf32> to vector<128x1xf32>
    %32 = arith.addf %29, %31 : vector<128x1xf32>
    %c0_23 = arith.constant 0 : index
    %c0_24 = arith.constant 0 : index
    %33 = vector.load %arg10[%c0_23, %c0_24] : memref<128x1xf32, #tpu.memory_space<vmem>>, vector<128x1xf32>
    tpu.vector_store %arg10[%c0_23, %c0_24], %32 {strides = array<i32>} : memref<128x1xf32, #tpu.memory_space<vmem>>, vector<128x1xf32>,
    return
  }
  func.func @transform_0(%arg0: i32) -> (i32, i32) {
    %c0_i32 = arith.constant 0 : i32
    %c0_i32_0 = arith.constant 0 : i32
    return %arg0, %c0_i32 : i32, i32
  }
  func.func @transform_1(%arg0: i32) -> (i32, i32) {
    %c0_i32 = arith.constant 0 : i32
    %c0_i32_0 = arith.constant 0 : i32
    %c0_i32_1 = arith.constant 0 : i32
    return %c0_i32, %c0_i32_0 : i32, i32
  }
  func.func @transform_2(%arg0: i32) -> (i32, i32) {
    %c0_i32 = arith.constant 0 : i32
    %c0_i32_0 = arith.constant 0 : i32
    %c0_i32_1 = arith.constant 0 : i32
    return %c0_i32, %c0_i32_0 : i32, i32
  }
  func.func @transform_3(%arg0: i32) -> (i32, i32) {
    %c0_i32 = arith.constant 0 : i32
    %c0_i32_0 = arith.constant 0 : i32
    %c0_i32_1 = arith.constant 0 : i32
    return %c0_i32, %c0_i32_0 : i32, i32
  }
  func.func @transform_4(%arg0: i32) -> (i32, i32) {
    %c0_i32 = arith.constant 0 : i32
    %c0_i32_0 = arith.constant 0 : i32
    %c0_i32_1 = arith.constant 0 : i32
    return %c0_i32, %c0_i32_0 : i32, i32
  }
  func.func @transform_5(%arg0: i32) -> (i32, i32) {
    %c0_i32 = arith.constant 0 : i32
    %c0_i32_0 = arith.constant 0 : i32
    %c0_i32_1 = arith.constant 0 : i32
    return %c0_i32, %c0_i32_0 : i32, i32
  }
  func.func @transform_6(%arg0: i32) -> (i32, i32) {
    %c0_i32 = arith.constant 0 : i32
    %c0_i32_0 = arith.constant 0 : i32
    %c0_i32_1 = arith.constant 0 : i32
    return %c0_i32, %c0_i32_0 : i32, i32
  }
  func.func @transform_7(%arg0: i32) -> (i32, i32) {
    %c0_i32 = arith.constant 0 : i32
    %c0_i32_0 = arith.constant 0 : i32
    %c0_i32_1 = arith.constant 0 : i32
    return %c0_i32, %c0_i32_0 : i32, i32
  }
  func.func @transform_8(%arg0: i32) -> (i32, i32) {
    %c0_i32 = arith.constant 0 : i32
    %c0_i32_0 = arith.constant 0 : i32
    %c0_i32_1 = arith.constant 0 : i32
    return %c0_i32, %c0_i32_0 : i32, i32
  }
  func.func @transform_9(%arg0: i32) -> (i32, i32) {
    %c0_i32 = arith.constant 0 : i32
    %c0_i32_0 = arith.constant 0 : i32
    return %arg0, %c0_i32 : i32, i32
  }
}

</mosaic_0001>

<bundles_post_ra>
// kernel: tpu_custom_call.1
= control target key start
LH: loop header
LB: loop body
LE: loop exit
PB: predicated region body
PF: predicated region fallthrough
CT: control target
= control target key end

     0   :  { %s2278_s0 = inlined_call_operand.vmem [shape: f32[200,32], index: 0, kind: input, shape index: {}]   ;;  %s2279_s1 = inlined_call_operand.vmem [shape: bf16[32,256], index: 1, kind: input, shape index: {}]   ;;  %s2280_s2 = inlined_call_operand.vmem [shape: f32[1,256], index: 2, kind: input, shape index: {}]   ;;  %s2281_s3 = inlined_call_operand.vmem [shape: bf16[256,128], index: 3, kind: input, shape index: {}]   ;;  %s2282_s4 = inlined_call_operand.vmem [shape: f32[1,128], index: 4, kind: input, shape index: {}]   ;;  %s2283_s5 = inlined_call_operand.vmem [shape: bf16[128,64], index: 5, kind: input, shape index: {}]   ;;  %s2284_s6 = inlined_call_operand.vmem [shape: f32[1,64], index: 6, kind: input, shape index: {}]   ;;  %s2285_s7 = inlined_call_operand.vmem [shape: f32[1,64], index: 7, kind: input, shape index: {}]   ;;  %s2286_s8 = inlined_call_operand.<no memory space> [shape: f32[1,1], index: 8, kind: input, shape index: {}]   ;;  %s2287_s9 = inlined_call_operand.vmem [shape: f32[200,1], index: 9, kind: output, shape index: {}]  }
   0x1   :  { %v14_v0 = vstv %s2286_s8 }
   0x2   :  { %15 = vst [vmem:[#allocation2] sm:$0x1] %v14_v0 }
   0x3   :  { %s1870_s11 = smov 0   ;;  %s1872_s12 = smov 0  }
   0x4   :  { %s1874_s13 = smov 0  }
   0x5 LB: > { %s1883_s8 = sadd.s32 4294967295, %s1782_s13   ;;  %s1885_s14 = sadd.s32 1, %s1782_s13   ;;  %s1782_s13 = sphi %s1874_s13, %s2294_s13   ;;  %s1778_s12 = sphi %s1872_s12, %s2293_s12   ;;  %s1774_s11 = sphi %s1870_s11, %s2292_s11  }
   0x6   : > { %s219_s15 = ssub.s32 %s1782_s13, %s1885_s14  ;;  %s222_s16 = sadd.s32 1, %s1778_s12 }
   0x7   : > { %p220_p0 = scmp.eq.s32.totalorder %s219_s15, 0  ;;  %p232_p1 = scmp.ne.s32.totalorder %s1778_s12, %s1774_s11 }
   0x8   : > { %p233_p2 = scmp.eq.s32.totalorder %s1883_s8, 1  ;;  %p1433_p3 = scmp.ge.s32.totalorder %s1782_s13, 1 }
   0x9   : > { %s1893_s17 = scalar_select %p220_p0, %s1778_s12, %s222_s16  }
   0xa   : > { %p1895_p4 = por %p233_p2, %p232_p1  ;;  %p298_p5 = scmp.lt.s32.totalorder %s1782_s13, 3 }
   0xc   : > { %p299_p6 = pnand %p1433_p3, %p298_p5 }
   0xd   : > { %v1698_v1 = vld [vmem:[%s2279_s1 + $0x4] ss:$8 sps:$4 sm:$0xff] (!%p299_p6)   ;;  %s1903_s21 = sshll.u32 (!%p299_p6), %s1883_s8, 4  ;;  %v1700_v2 = vld [vmem:[%s2279_s1] ss:$8 sps:$4 sm:$0xff] (!%p299_p6)   ;;  %v1816_v3 = vmov (!%p299_p6), 0   ;;  %v387_v49 = vlaneseq (!%p299_p6) }
   0xe   : > { %302 = sbr.rel (%p299_p6) target bundleno = 949 (0x3b5), region = 56  ;;  %474 = vmatprep.mubr.bf16.mxu0 (!%p299_p6), %v1816_v3  ;;  %p342_p7 = scmp.lt.s32.totalorder (!%p299_p6), %s1903_s21, 24  ;;  %442 = vmatprep.subr.bf16.mxu0 (!%p299_p6), %v1698_v1  ;;  %v1701_v4 = vld [vmem:[%s2279_s1 + $0x14] ss:$8 sps:$4 sm:$0xff] (!%p299_p6)   ;;  %v1703_v5 = vld [vmem:[%s2279_s1 + $0x10] ss:$8 sps:$4 sm:$0xff] (!%p299_p6)  }
   0xf   : > { %443 = vmatpush1.bf16.msra.mxu0 (!%p299_p6), %v1700_v2  ;;  %v1704_v6 = vld [vmem:[%s2281_s3 + $0x40] sm:$0xff] (!%p299_p6)   ;;  %v1706_v8 = vld [vmem:[%s2281_s3 + $0x48] sm:$0xff] (!%p299_p6)   ;;  %vm417_vm0 = vcmask (!%p299_p6), 261120   ;;  %v1708_v15 = vld [vmem:[%s2281_s3 + $0x50] sm:$0xff] (!%p299_p6)   ;;  %v388_v50 = vshrl.u32 (!%p299_p6), %v387_v49, 7  ;;  %vm1066_vm1 = vcmask (!%p299_p6), 523264  }
  0x10   : > { %444 = vmatprep.subr.bf16.mxu0 (!%p299_p6), %v1701_v4  ;;  %v1705_v7 = vld [vmem:[%s2281_s3] sm:$0xff] (!%p299_p6)   ;;  %1497 = vmatprep.subr.bf16.mxu1 (!%p299_p6), %v1704_v6  ;;  %v1707_v9 = vld [vmem:[%s2281_s3 + $0x8] sm:$0xff] (!%p299_p6)   ;;  %v1709_v16 = vld [vmem:[%s2281_s3 + $0x10] sm:$0xff] (!%p299_p6)   ;;  %s334_s30 = sand.u32 (!%p299_p6), 1, %s1774_s11   ;;  %vm1138_vm2 = vcmask (!%p299_p6), 7168  }
  0x11   : > { %1498 = vmatpush3.bf16.msra.mxu1 (!%p299_p6), %v1705_v7  ;;  %v1710_v18 = vld [vmem:[%s2281_s3 + $0x58] sm:$0xff] (!%p299_p6)   ;;  %v1712_v20 = vld [vmem:[%s2281_s3 + $0x60] sm:$0xff] (!%p299_p6)   ;;  %v1714_v24 = vld [vmem:[%s2281_s3 + $0x68] sm:$0xff] (!%p299_p6)   ;;  %v389_v51 = vsub.s32 (!%p299_p6), 0, %v388_v50  ;;  %v393_v53 = vsub.s32 (!%p299_p6), 1, %v388_v50  ;;  %s1434_s10 = sshll.u32 (!%p299_p6), %s334_s30, 7 }
  0x12   : > { %1499 = vmatprep.subr.bf16.mxu1 (!%p299_p6), %v1706_v8  ;;  %v1711_v19 = vld [vmem:[%s2281_s3 + $0x18] sm:$0xff] (!%p299_p6)   ;;  %v1713_v23 = vld [vmem:[%s2281_s3 + $0x20] sm:$0xff] (!%p299_p6)   ;;  %v1715_v41 = vld [vmem:[%s2281_s3 + $0x28] sm:$0xff] (!%p299_p6)   ;;  %s2144_s13 = scalar_lea.vmem (!%p299_p6), [#allocation3], %s1434_s10  }
  0x13   : > { %445 = vmatpush1.bf16.msra.mxu0 (!%p299_p6), %v1703_v5  ;;  %v1716_v42 = vld [vmem:[%s2281_s3 + $0x70] sm:$0xff] (!%p299_p6)   ;;  %v1718_v44 = vld [vmem:[%s2281_s3 + $0x78] sm:$0xff] (!%p299_p6)   ;;  %v1720_v46 = vld [vmem:[%s2283_s5] sm:$0xff] (!%p299_p6)  }
  0x14   : > { %v1717_v43 = vld [vmem:[%s2281_s3 + $0x30] sm:$0xff] (!%p299_p6)   ;;  %v1719_v45 = vld [vmem:[%s2281_s3 + $0x38] sm:$0xff] (!%p299_p6)   ;;  %v1721_v47 = vld [vmem:[%s2283_s5 + $0x8] sm:$0xff] (!%p299_p6)   ;;  %1577 = vmatprep.subr.bf16.mxu0 (!%p299_p6), %v1720_v46 }
  0x15   : > { %s343_s28 = scalar_select %p342_p7, %s1903_s21, 24  ;;  %1500 = vmatpush3.bf16.msra.mxu1 %v1707_v9  ;;  %v1722_v48 = vld [vmem:[%s2283_s5 + $0x10] sm:$0xff]   ;;  %v385_v52 = vld [vmem:[%s2280_s2] sm:$0x3] }
  0x16   : > { %1501 = vmatprep.subr.bf16.mxu1 %v1708_v15  ;;  %v2013_v54 = vrot.slane %v385_v52, %v389_v51  ;;  %v2015_v55 = vrot.slane %v385_v52, %v393_v53  ;;  %s1163_s11 = ssub.s32 (%p1895_p4), 25, %s1903_s21 }
  0x17   : > { %s1436_s15 = sshll.u32 %s343_s28, 3  ;;  %p1164_p8 = scmp.lt.s32.totalorder (%p1895_p4), %s1163_s11, 16 }
  0x18   : > { %s1929_s23 = scalar_lea.vmem %s2278_s0, %s1436_s15 }
  0x19   : > { %v357_v10 = vld [vmem:[%s1929_s23] sm:$0xff]  ;;  %v358_v11 = vld [vmem:[%s1929_s23 + $0x8] sm:$0xff]  ;;  %v359_v13 = vld [vmem:[%s1929_s23 + $0x10] sm:$0xff]  ;;  %1502 = vmatpush3.bf16.msra.mxu1 %v1709_v16 }
  0x1a   : > { %v373_v12 = vpack.c.bf16 %v358_v11, %v357_v10  ;;  %v360_v14 = vld [vmem:[%s1929_s23 + $0x18] sm:$0xff]  ;;  %1503 = vmatprep.subr.bf16.mxu1 %v1710_v18  ;;  %v361_v21 = vld [vmem:[%s1929_s23 + $0x20] sm:$0xff]  ;;  %v362_v22 = vld [vmem:[%s1929_s23 + $0x28] sm:$0xff] }
  0x1b   : > { %v374_v17 = vpack.c.bf16 %v360_v14, %v359_v13  ;;  %v375_v25 = vpack.c.bf16 %v362_v22, %v361_v21  ;;  %v363_v26 = vld [vmem:[%s1929_s23 + $0x30] sm:$0xff]  ;;  %v364_v27 = vld [vmem:[%s1929_s23 + $0x38] sm:$0xff]  ;;  %v365_v29 = vld [vmem:[%s1929_s23 + $0x40] sm:$0xff] }
  0x1c   : > { %1441 = vmatmul.mubr.msk.bf16.vlgmr.msra.gmra.mrb[0].mxu0 %vm417_vm0, %v373_v12  ;;  %v376_v28 = vpack.c.bf16 %v364_v27, %v363_v26  ;;  %v366_v30 = vld [vmem:[%s1929_s23 + $0x48] sm:$0xff]  ;;  %v367_v32 = vld [vmem:[%s1929_s23 + $0x50] sm:$0xff]  ;;  %v368_v33 = vld [vmem:[%s1929_s23 + $0x58] sm:$0xff] }
  0x1d   : > { %484 = vmatprep.mubr.bf16.mxu0 %v1816_v3  ;;  %1504 = vmatpush3.bf16.msra.mxu1 %v1711_v19  ;;  %v377_v31 = vpack.c.bf16 %v366_v30, %v365_v29  ;;  %v378_v34 = vpack.c.bf16 %v368_v33, %v367_v32  ;;  %v369_v35 = vld [vmem:[%s1929_s23 + $0x60] sm:$0xff]  ;;  %v370_v36 = vld [vmem:[%s1929_s23 + $0x68] sm:$0xff]  ;;  %v371_v38 = vld [vmem:[%s1929_s23 + $0x70] sm:$0xff] }
  0x1e   : > { %1505 = vmatprep.subr.bf16.mxu1 %v1712_v20  ;;  %v379_v37 = vpack.c.bf16 %v370_v36, %v369_v35  ;;  %v372_v39 = vld [vmem:[%s1929_s23 + $0x78] sm:$0xff]  ;;  %1578 = vmatpush3.bf16.msra.mxu0 %v1720_v46  ;;  %s1494_s23 = sshll.u32 (%p1895_p4), %s1883_s8, 7 }
  0x1f   : > { %v380_v40 = vpack.c.bf16 %v372_v39, %v371_v38  ;;  %1579 = vmatprep.subr.bf16.mxu0 %v1721_v47  ;;  %s2185_s19 = scalar_lea.vmem (%p1895_p4), %s2287_s9, %s1494_s23  }
  0x21   : > { %1506 = vmatpush3.bf16.msra.mxu1 %v1713_v23 }
  0x22   : > { %1507 = vmatprep.subr.bf16.mxu1 %v1714_v24  ;;  %1580 = vmatpush3.bf16.msra.mxu0 %v1721_v47 }
  0x23   : > { %1581 = vmatprep.subr.bf16.mxu0 %v1722_v48 }
  0x24   : > { %1442 = vmatmul.mubr.msk.bf16.gmra.mrb[4].mxu0 %vm417_vm0, %v374_v17 }
  0x25   : > { %494 = vmatprep.mubr.bf16.mxu0 %v1816_v3  ;;  %1508 = vmatpush3.bf16.msra.mxu1 %v1715_v41 }
  0x26   : > { %1509 = vmatprep.subr.bf16.mxu1 %v1716_v42  ;;  %1582 = vmatpush3.bf16.msra.mxu0 %v1722_v48 }
  0x29   : > { %1510 = vmatpush3.bf16.msra.mxu1 %v1717_v43 }
  0x2a   : > { %1511 = vmatprep.subr.bf16.mxu1 %v1718_v44 }
  0x2c   : > { %1443 = vmatmul.mubr.msk.bf16.gmra.mrb[8].mxu0 %vm417_vm0, %v375_v25 }
  0x2d   : > { %504 = vmatprep.mubr.bf16.mxu0 %v1816_v3  ;;  %1512 = vmatpush3.bf16.msra.mxu1 %v1719_v45 }
  0x34   : > { %1444 = vmatmul.mubr.msk.bf16.gmra.mrb[12].mxu0 %vm417_vm0, %v376_v28 }
  0x35   : > { %514 = vmatprep.mubr.bf16.mxu0 %v1816_v3 }
  0x3c   : > { %1445 = vmatmul.mubr.msk.bf16.gmra.mrb[16].mxu0 %vm417_vm0, %v377_v31 }
  0x3d   : > { %524 = vmatprep.mubr.bf16.mxu0 %v1816_v3 }
  0x44   : > { %1446 = vmatmul.mubr.msk.bf16.gmra.mrb[20].mxu0 %vm417_vm0, %v378_v34 }
  0x45   : > { %534 = vmatprep.mubr.bf16.mxu0 %v1816_v3 }
  0x4c   : > { %1447 = vmatmul.mubr.msk.bf16.gmra.mrb[24].mxu0 %vm417_vm0, %v379_v37 }
  0x4d   : > { %544 = vmatprep.mubr.bf16.mxu0 %v1816_v3 }
  0x54   : > { %1448 = vmatmul.mubr.msk.bf16.gmra.mrb[28].mxu0 %vm417_vm0, %v380_v40 }
  0xef   : > { %v476_v56 = vpop.f32.mrb[0].mxu0 }
  0xf0   : > { %v477_v57 = vadd.f32 %v476_v56, %v2013_v54  ;;  %v478_v58 = vpop.f32.mrb[1].mxu0 }
  0xf1   : > { %v479_v59 = vadd.f32 %v478_v58, %v2015_v55  ;;  %v480_v60 = vpop.f32.mrb[2].mxu0 }
  0xf2   : > { %v481_v61 = vadd.f32 %v480_v60, %v2013_v54  ;;  %v482_v62 = vpop.f32.mrb[3].mxu0  ;;  %v555_v0 = vmax.f32 %v477_v57, 0.0 }
  0xf3   : > { %v483_v63 = vadd.f32 %v482_v62, %v2015_v55  ;;  %v556_v2 = vmax.f32 %v479_v59, 0.0 }
  0xf4   : > { %v557_v1 = vmax.f32 %v481_v61, 0.0 }
  0xf5   : > { %v558_v3 = vmax.f32 %v483_v63, 0.0 }
  0xf6   : > { %v587_v4 = vpack.c.bf16 %v557_v1, %v555_v0 }
  0xf7   : > { %v486_v5 = vpop.f32.mrb[4].mxu0  ;;  %v588_v6 = vpack.c.bf16 %v558_v3, %v556_v2 }
  0xf8   : > { %v487_v7 = vadd.f32 %v486_v5, %v2013_v54  ;;  %v488_v8 = vpop.f32.mrb[5].mxu0 }
  0xf9   : > { %v489_v9 = vadd.f32 %v488_v8, %v2015_v55  ;;  %v490_v10 = vpop.f32.mrb[6].mxu0  ;;  %770 = vmatprep.mubr.bf16.mxu1 %v588_v6 }
  0xfa   : > { %v491_v11 = vadd.f32 %v490_v10, %v2013_v54  ;;  %v492_v12 = vpop.f32.mrb[7].mxu0  ;;  %771 = vmatmul.mubr.bf16.vlgmr.msra.gmra.mrb[0].mxu1 %v587_v4  ;;  %v559_v14 = vmax.f32 %v487_v7, 0.0 }
  0xfb   : > { %v493_v13 = vadd.f32 %v492_v12, %v2015_v55  ;;  %v560_v16 = vmax.f32 %v489_v9, 0.0 }
  0xfc   : > { %v561_v15 = vmax.f32 %v491_v11, 0.0 }
  0xfd   : > { %v562_v17 = vmax.f32 %v493_v13, 0.0 }
  0xfe   : > { %v589_v18 = vpack.c.bf16 %v561_v15, %v559_v14 }
  0xff   : > { %v590_v19 = vpack.c.bf16 %v562_v17, %v560_v16  ;;  %v496_v20 = vpop.f32.mrb[8].mxu0 }
 0x100   : > { %v497_v21 = vadd.f32 %v496_v20, %v2013_v54  ;;  %v498_v22 = vpop.f32.mrb[9].mxu0 }
 0x101   : > { %v499_v23 = vadd.f32 %v498_v22, %v2015_v55  ;;  %v500_v24 = vpop.f32.mrb[10].mxu0  ;;  %778 = vmatprep.mubr.bf16.mxu1 %v590_v19 }
 0x102   : > { %v501_v25 = vadd.f32 %v500_v24, %v2013_v54  ;;  %v502_v26 = vpop.f32.mrb[11].mxu0  ;;  %779 = vmatmul.mubr.bf16.gmra.mrb[4].mxu1 %v589_v18  ;;  %v563_v28 = vmax.f32 %v497_v21, 0.0 }
 0x103   : > { %v503_v27 = vadd.f32 %v502_v26, %v2015_v55  ;;  %v564_v30 = vmax.f32 %v499_v23, 0.0 }
 0x104   : > { %v565_v29 = vmax.f32 %v501_v25, 0.0 }
 0x105   : > { %v566_v31 = vmax.f32 %v503_v27, 0.0 }
 0x106   : > { %v591_v32 = vpack.c.bf16 %v565_v29, %v563_v28 }
 0x107   : > { %v592_v33 = vpack.c.bf16 %v566_v31, %v564_v30  ;;  %v506_v34 = vpop.f32.mrb[12].mxu0 }
 0x108   : > { %v507_v35 = vadd.f32 %v506_v34, %v2013_v54  ;;  %v508_v36 = vpop.f32.mrb[13].mxu0 }
 0x109   : > { %v509_v37 = vadd.f32 %v508_v36, %v2015_v55  ;;  %v510_v38 = vpop.f32.mrb[14].mxu0  ;;  %786 = vmatprep.mubr.bf16.mxu1 %v592_v33 }
 0x10a   : > { %v511_v39 = vadd.f32 %v510_v38, %v2013_v54  ;;  %v512_v40 = vpop.f32.mrb[15].mxu0  ;;  %787 = vmatmul.mubr.bf16.gmra.mrb[8].mxu1 %v591_v32  ;;  %v567_v42 = vmax.f32 %v507_v35, 0.0 }
 0x10b   : > { %v513_v41 = vadd.f32 %v512_v40, %v2015_v55  ;;  %v568_v44 = vmax.f32 %v509_v37, 0.0 }
 0x10c   : > { %v569_v43 = vmax.f32 %v511_v39, 0.0 }
 0x10d   : > { %v570_v45 = vmax.f32 %v513_v41, 0.0 }
 0x10e   : > { %v593_v46 = vpack.c.bf16 %v569_v43, %v567_v42  ;;  %v1723_v42 = vld [vmem:[%s2283_s5 + $0x18] sm:$0xff]   ;;  %v1726_v43 = vld [vmem:[%s2283_s5 + $0x30] sm:$0xff]  }
 0x10f   : > { %v594_v47 = vpack.c.bf16 %v570_v45, %v568_v44  ;;  %v516_v48 = vpop.f32.mrb[16].mxu0  ;;  %1583 = vmatprep.subr.bf16.mxu0 %v1723_v42  ;;  %v1727_v44 = vld [vmem:[%s2283_s5 + $0x38] sm:$0xff]  }
 0x110   : > { %v517_v49 = vadd.f32 %v516_v48, %v2013_v54  ;;  %v518_v50 = vpop.f32.mrb[17].mxu0  ;;  %1584 = vmatpush3.bf16.msra.mxu0 %v1723_v42 }
 0x111   : > { %v519_v51 = vadd.f32 %v518_v50, %v2015_v55  ;;  %v520_v52 = vpop.f32.mrb[18].mxu0  ;;  %794 = vmatprep.mubr.bf16.mxu1 %v594_v47 }
 0x112   : > { %v521_v53 = vadd.f32 %v520_v52, %v2013_v54  ;;  %v522_v56 = vpop.f32.mrb[19].mxu0  ;;  %795 = vmatmul.mubr.bf16.gmra.mrb[12].mxu1 %v593_v46  ;;  %v571_v58 = vmax.f32 %v517_v49, 0.0  ;;  %v2067_v46 = vld [vmem:[%s2282_s4] ss:$0 sm:$0xff] }
 0x113   : > { %v523_v57 = vadd.f32 %v522_v56, %v2015_v55  ;;  %v572_v60 = vmax.f32 %v519_v51, 0.0 }
 0x114   : > { %v573_v59 = vmax.f32 %v521_v53, 0.0 }
 0x115   : > { %v574_v61 = vmax.f32 %v523_v57, 0.0 }
 0x116   : > { %v595_v62 = vpack.c.bf16 %v573_v59, %v571_v58 }
 0x117   : > { %v596_v63 = vpack.c.bf16 %v574_v61, %v572_v60  ;;  %v526_v0 = vpop.f32.mrb[20].mxu0 }
 0x118   : > { %v527_v1 = vadd.f32 %v526_v0, %v2013_v54  ;;  %v528_v2 = vpop.f32.mrb[21].mxu0 }
 0x119   : > { %v529_v3 = vadd.f32 %v528_v2, %v2015_v55  ;;  %v530_v4 = vpop.f32.mrb[22].mxu0  ;;  %802 = vmatprep.mubr.bf16.mxu1 %v596_v63 }
 0x11a   : > { %v531_v5 = vadd.f32 %v530_v4, %v2013_v54  ;;  %v532_v6 = vpop.f32.mrb[23].mxu0  ;;  %803 = vmatmul.mubr.bf16.gmra.mrb[16].mxu1 %v595_v62  ;;  %v575_v8 = vmax.f32 %v527_v1, 0.0 }
 0x11b   : > { %v533_v7 = vadd.f32 %v532_v6, %v2015_v55  ;;  %v576_v10 = vmax.f32 %v529_v3, 0.0 }
 0x11c   : > { %v577_v9 = vmax.f32 %v531_v5, 0.0 }
 0x11d   : > { %v578_v11 = vmax.f32 %v533_v7, 0.0 }
 0x11e   : > { %v597_v12 = vpack.c.bf16 %v577_v9, %v575_v8 }
 0x11f   : > { %v598_v13 = vpack.c.bf16 %v578_v11, %v576_v10  ;;  %v536_v14 = vpop.f32.mrb[24].mxu0 }
 0x120   : > { %v537_v15 = vadd.f32 %v536_v14, %v2013_v54  ;;  %v538_v16 = vpop.f32.mrb[25].mxu0 }
 0x121   : > { %v539_v17 = vadd.f32 %v538_v16, %v2015_v55  ;;  %v540_v18 = vpop.f32.mrb[26].mxu0  ;;  %810 = vmatprep.mubr.bf16.mxu1 %v598_v13 }
 0x122   : > { %v541_v19 = vadd.f32 %v540_v18, %v2013_v54  ;;  %v542_v20 = vpop.f32.mrb[27].mxu0  ;;  %811 = vmatmul.mubr.bf16.gmra.mrb[20].mxu1 %v597_v12  ;;  %v579_v22 = vmax.f32 %v537_v15, 0.0 }
 0x123   : > { %v543_v21 = vadd.f32 %v542_v20, %v2015_v55  ;;  %v580_v24 = vmax.f32 %v539_v17, 0.0 }
 0x124   : > { %v581_v23 = vmax.f32 %v541_v19, 0.0 }
 0x125   : > { %v582_v25 = vmax.f32 %v543_v21, 0.0 }
 0x126   : > { %v599_v26 = vpack.c.bf16 %v581_v23, %v579_v22 }
 0x127   : > { %v600_v27 = vpack.c.bf16 %v582_v25, %v580_v24  ;;  %v546_v28 = vpop.f32.mrb[28].mxu0 }
 0x128   : > { %v547_v29 = vadd.f32 %v546_v28, %v2013_v54  ;;  %v548_v30 = vpop.f32.mrb[29].mxu0 }
 0x129   : > { %v549_v31 = vadd.f32 %v548_v30, %v2015_v55  ;;  %v550_v32 = vpop.f32.mrb[30].mxu0  ;;  %818 = vmatprep.mubr.bf16.mxu1 %v600_v27 }
 0x12a   : > { %v551_v33 = vadd.f32 %v550_v32, %v2013_v54  ;;  %v552_v34 = vpop.f32.mrb[31].mxu0  ;;  %819 = vmatmul.mubr.bf16.gmra.mrb[24].mxu1 %v599_v26  ;;  %v583_v36 = vmax.f32 %v547_v29, 0.0  ;;  %v1724_v54 = vld [vmem:[%s2283_s5 + $0x20] sm:$0xff]  }
 0x12b   : > { %v553_v35 = vadd.f32 %v552_v34, %v2015_v55  ;;  %v584_v38 = vmax.f32 %v549_v31, 0.0  ;;  %1585 = vmatprep.subr.bf16.mxu0 %v1724_v54  ;;  %v1725_v55 = vld [vmem:[%s2283_s5 + $0x28] sm:$0xff]  }
 0x12c   : > { %v585_v37 = vmax.f32 %v551_v33, 0.0  ;;  %1586 = vmatpush3.bf16.msra.mxu0 %v1724_v54 }
 0x12d   : > { %v586_v39 = vmax.f32 %v553_v35, 0.0  ;;  %1587 = vmatprep.subr.bf16.mxu0 %v1725_v55 }
 0x12e   : > { %v601_v40 = vpack.c.bf16 %v585_v37, %v583_v36 }
 0x12f   : > { %v602_v41 = vpack.c.bf16 %v586_v39, %v584_v38 }
 0x130   : > { %1588 = vmatpush3.bf16.msra.mxu0 %v1725_v55 }
 0x131   : > { %826 = vmatprep.mubr.bf16.mxu1 %v602_v41  ;;  %1589 = vmatprep.subr.bf16.mxu0 %v1726_v43 }
 0x132   : > { %827 = vmatmul.mubr.bf16.gmra.mrb[28].mxu1 %v601_v40 }
 0x134   : > { %1590 = vmatpush3.bf16.msra.mxu0 %v1726_v43 }
 0x135   : > { %1591 = vmatprep.subr.bf16.mxu0 %v1727_v44 }
 0x138   : > { %1592 = vmatpush3.bf16.msra.mxu0 %v1727_v44 }
 0x1cd   : > { %v1513_v45 = vpop.f32.mrb[0].mxu1 }
 0x1ce   : > { %v1514_v47 = vpop.f32.mrb[1].mxu1 }
 0x1cf   : > { %v1515_v48 = vadd.f32 %v1514_v47, %v1513_v45  ;;  %v1516_v49 = vpop.f32.mrb[2].mxu1 }
 0x1d0   : > { %v1517_v50 = vpop.f32.mrb[3].mxu1 }
 0x1d1   : > { %v773_v51 = vadd.f32 %v1515_v48, %v2067_v46  ;;  %v1518_v52 = vadd.f32 %v1517_v50, %v1516_v49 }
 0x1d3   : > { %v776_v53 = vadd.f32 %v1518_v52, %v2067_v46  ;;  %v835_v56 = vmax.f32 %v773_v51, 0.0 }
 0x1d5   : > { %v836_v57 = vmax.f32 %v776_v53, 0.0  ;;  %v1519_v58 = vpop.f32.mrb[4].mxu1 }
 0x1d6   : > { %v1520_v59 = vpop.f32.mrb[5].mxu1 }
 0x1d7   : > { %v1521_v60 = vadd.f32 %v1520_v59, %v1519_v58  ;;  %v1522_v61 = vpop.f32.mrb[6].mxu1  ;;  %v851_v62 = vpack.c.bf16 %v836_v57, %v835_v56 }
 0x1d8   : > { %v1523_v63 = vpop.f32.mrb[7].mxu1 }
 0x1d9   : > { %v781_v0 = vadd.f32 %v1521_v60, %v2067_v46  ;;  %v1524_v1 = vadd.f32 %v1523_v63, %v1522_v61  ;;  %1593 = vmatprep.mubr.bf16.mxu0 %v851_v62 }
 0x1db   : > { %v784_v2 = vadd.f32 %v1524_v1, %v2067_v46  ;;  %v837_v3 = vmax.f32 %v781_v0, 0.0 }
 0x1dd   : > { %v838_v4 = vmax.f32 %v784_v2, 0.0  ;;  %v1525_v5 = vpop.f32.mrb[8].mxu1 }
 0x1de   : > { %v1526_v6 = vpop.f32.mrb[9].mxu1 }
 0x1df   : > { %v852_v7 = vpack.c.bf16 %v838_v4, %v837_v3  ;;  %v1527_v8 = vadd.f32 %v1526_v6, %v1525_v5  ;;  %v1528_v9 = vpop.f32.mrb[10].mxu1 }
 0x1e0   : > { %v1529_v10 = vpop.f32.mrb[11].mxu1 }
 0x1e1   : > { %v789_v11 = vadd.f32 %v1527_v8, %v2067_v46  ;;  %v1530_v12 = vadd.f32 %v1529_v10, %v1528_v9  ;;  %1594 = vmatmul.mubr.bf16.vlgmr.msra.gmra.mrb[32].mxu0 %v852_v7  ;;  %v2088_v9 = vld [vmem:[%s2284_s6] ss:$0 sm:$0xff] }
 0x1e3   : > { %v792_v13 = vadd.f32 %v1530_v12, %v2067_v46  ;;  %v839_v14 = vmax.f32 %v789_v11, 0.0 }
 0x1e5   : > { %v840_v15 = vmax.f32 %v792_v13, 0.0  ;;  %v1531_v16 = vpop.f32.mrb[12].mxu1 }
 0x1e6   : > { %v1532_v17 = vpop.f32.mrb[13].mxu1 }
 0x1e7   : > { %v1533_v18 = vadd.f32 %v1532_v17, %v1531_v16  ;;  %v1534_v19 = vpop.f32.mrb[14].mxu1  ;;  %v853_v20 = vpack.c.bf16 %v840_v15, %v839_v14 }
 0x1e8   : > { %v1535_v21 = vpop.f32.mrb[15].mxu1 }
 0x1e9   : > { %v797_v22 = vadd.f32 %v1533_v18, %v2067_v46  ;;  %v1536_v23 = vadd.f32 %v1535_v21, %v1534_v19  ;;  %1597 = vmatprep.mubr.bf16.mxu0 %v853_v20 }
 0x1eb   : > { %v800_v24 = vadd.f32 %v1536_v23, %v2067_v46  ;;  %v841_v25 = vmax.f32 %v797_v22, 0.0 }
 0x1ed   : > { %v842_v26 = vmax.f32 %v800_v24, 0.0  ;;  %v1537_v27 = vpop.f32.mrb[16].mxu1 }
 0x1ee   : > { %v1538_v28 = vpop.f32.mrb[17].mxu1 }
 0x1ef   : > { %v1539_v29 = vadd.f32 %v1538_v28, %v1537_v27  ;;  %v1540_v30 = vpop.f32.mrb[18].mxu1  ;;  %v854_v31 = vpack.c.bf16 %v842_v26, %v841_v25 }
 0x1f0   : > { %v1541_v32 = vpop.f32.mrb[19].mxu1 }
 0x1f1   : > { %v805_v33 = vadd.f32 %v1539_v29, %v2067_v46  ;;  %v1542_v34 = vadd.f32 %v1541_v32, %v1540_v30  ;;  %1598 = vmatmul.mubr.bf16.gmra.mrb[36].mxu0 %v854_v31 }
 0x1f3   : > { %v808_v35 = vadd.f32 %v1542_v34, %v2067_v46  ;;  %v843_v36 = vmax.f32 %v805_v33, 0.0 }
 0x1f5   : > { %v844_v37 = vmax.f32 %v808_v35, 0.0  ;;  %v1543_v38 = vpop.f32.mrb[20].mxu1 }
 0x1f6   : > { %v1544_v39 = vpop.f32.mrb[21].mxu1 }
 0x1f7   : > { %v1545_v40 = vadd.f32 %v1544_v39, %v1543_v38  ;;  %v1546_v41 = vpop.f32.mrb[22].mxu1  ;;  %v855_v42 = vpack.c.bf16 %v844_v37, %v843_v36 }
 0x1f8   : > { %v1547_v54 = vpop.f32.mrb[23].mxu1 }
 0x1f9   : > { %v813_v55 = vadd.f32 %v1545_v40, %v2067_v46  ;;  %v1548_v43 = vadd.f32 %v1547_v54, %v1546_v41  ;;  %1601 = vmatprep.mubr.bf16.mxu0 %v855_v42 }
 0x1fb   : > { %v816_v44 = vadd.f32 %v1548_v43, %v2067_v46  ;;  %v845_v45 = vmax.f32 %v813_v55, 0.0 }
 0x1fd   : > { %v846_v47 = vmax.f32 %v816_v44, 0.0  ;;  %v1549_v48 = vpop.f32.mrb[24].mxu1 }
 0x1fe   : > { %v1550_v49 = vpop.f32.mrb[25].mxu1 }
 0x1ff   : > { %v1551_v50 = vadd.f32 %v1550_v49, %v1549_v48  ;;  %v1552_v51 = vpop.f32.mrb[26].mxu1  ;;  %v856_v52 = vpack.c.bf16 %v846_v47, %v845_v45 }
 0x200   : > { %v1553_v53 = vpop.f32.mrb[27].mxu1 }
 0x201   : > { %v821_v56 = vadd.f32 %v1551_v50, %v2067_v46  ;;  %v1554_v57 = vadd.f32 %v1553_v53, %v1552_v51  ;;  %1602 = vmatmul.mubr.bf16.gmra.mrb[40].mxu0 %v856_v52 }
 0x203   : > { %v824_v58 = vadd.f32 %v1554_v57, %v2067_v46  ;;  %v847_v59 = vmax.f32 %v821_v56, 0.0 }
 0x205   : > { %v848_v60 = vmax.f32 %v824_v58, 0.0  ;;  %v1555_v61 = vpop.f32.mrb[28].mxu1 }
 0x206   : > { %v1556_v62 = vpop.f32.mrb[29].mxu1 }
 0x207   : > { %v1557_v63 = vadd.f32 %v1556_v62, %v1555_v61  ;;  %v1558_v0 = vpop.f32.mrb[30].mxu1  ;;  %v857_v1 = vpack.c.bf16 %v848_v60, %v847_v59 }
 0x208   : > { %v1559_v2 = vpop.f32.mrb[31].mxu1 }
 0x209   : > { %v829_v3 = vadd.f32 %v1557_v63, %v2067_v46  ;;  %v1560_v4 = vadd.f32 %v1559_v2, %v1558_v0  ;;  %1605 = vmatprep.mubr.bf16.mxu0 %v857_v1 }
 0x20b   : > { %v832_v5 = vadd.f32 %v1560_v4, %v2067_v46  ;;  %v849_v6 = vmax.f32 %v829_v3, 0.0  ;;  %v2095_v46 = vld [vmem:[%s2285_s7] ss:$0 sm:$0xff] }
 0x20d   : > { %v850_v7 = vmax.f32 %v832_v5, 0.0 }
 0x20f   : > { %v858_v8 = vpack.c.bf16 %v850_v7, %v849_v6 }
 0x211   : > { %1606 = vmatmul.mubr.bf16.gmra.mrb[44].mxu0 %v858_v8 }
 0x2b4   : > { %v1595_v10 = vpop.f32.mrb[32].mxu0 }
 0x2b5   : > { %v973_v11 = vadd.f32 %v1595_v10, %v2088_v9  ;;  %v964_v12 = vpop.f32.mrb[33].mxu0 }
 0x2b6   : > { %v965_v13 = vadd.f32 %v2088_v9, %v964_v12  ;;  %v1596_v14 = vpop.f32.mrb[34].mxu0 }
 0x2b7   : > { %v1029_v15 = vmax.f32 %v973_v11, 0.0  ;;  %v976_v16 = vadd.f32 %v1596_v14, %v2088_v9  ;;  %v967_v17 = vpop.f32.mrb[35].mxu0 }
 0x2b8   : > { %v1027_v18 = vmax.f32 %v965_v13, 0.0  ;;  %v968_v19 = vadd.f32 %v2088_v9, %v967_v17 }
 0x2b9   : > { %v1030_v20 = vmax.f32 %v976_v16, 0.0  ;;  %v1052_v21 = vmul.f32 %v2095_v46, %v1029_v15 }
 0x2ba   : > { %v1028_v22 = vmax.f32 %v968_v19, 0.0  ;;  %v1050_v23 = vmul.f32 %v2095_v46, %v1027_v18 }
 0x2bb   : > { %v1073_v24 = vsel %vm1066_vm1, %v1052_v21, 0.0  ;;  %v1053_v25 = vmul.f32 %v2095_v46, %v1030_v20 }
 0x2bc   : > { %1074 = vadd.xlane.f32.xlu1 %v1073_v24  ;;  %v1067_v26 = vsel %vm1066_vm1, %v1050_v23, 0.0  ;;  %v1051_v27 = vmul.f32 %v2095_v46, %v1028_v22 }
 0x2bd   : > { %1068 = vadd.xlane.f32.xlu0 %v1067_v26  ;;  %v1076_v28 = vsel %vm1066_vm1, %v1053_v25, 0.0 }
 0x2be   : > { %v1070_v29 = vsel %vm1066_vm1, %v1051_v27, 0.0  ;;  %v1476_v27 = vld [vmem:[#allocation2] ss:$0 sm:$0xff] }
 0x2c0   : > { %1077 = vadd.xlane.f32.xlu1 %v1076_v28 }
 0x2c1   : > { %1071 = vadd.xlane.f32.xlu0 %v1070_v29 }
 0x2c4   : > { %v1599_v30 = vpop.f32.mrb[36].mxu0 }
 0x2c5   : > { %v989_v31 = vadd.f32 %v1599_v30, %v2088_v9  ;;  %v980_v32 = vpop.f32.mrb[37].mxu0 }
 0x2c6   : > { %v981_v33 = vadd.f32 %v2088_v9, %v980_v32  ;;  %v1600_v34 = vpop.f32.mrb[38].mxu0 }
 0x2c7   : > { %v1033_v35 = vmax.f32 %v989_v31, 0.0  ;;  %v992_v36 = vadd.f32 %v1600_v34, %v2088_v9  ;;  %v983_v37 = vpop.f32.mrb[39].mxu0 }
 0x2c8   : > { %v1031_v38 = vmax.f32 %v981_v33, 0.0  ;;  %v984_v39 = vadd.f32 %v2088_v9, %v983_v37 }
 0x2c9   : > { %v1034_v40 = vmax.f32 %v992_v36, 0.0  ;;  %v1056_v41 = vmul.f32 %v2095_v46, %v1033_v35 }
 0x2ca   : > { %v1032_v42 = vmax.f32 %v984_v39, 0.0  ;;  %v1054_v43 = vmul.f32 %v2095_v46, %v1031_v38 }
 0x2cb   : > { %v1085_v54 = vsel %vm1066_vm1, %v1056_v41, 0.0  ;;  %v1057_v55 = vmul.f32 %v2095_v46, %v1034_v40 }
 0x2cc   : > { %1086 = vadd.xlane.f32.xlu0 %v1085_v54  ;;  %v1055_v45 = vmul.f32 %v2095_v46, %v1032_v42  ;;  %v1079_v47 = vsel %vm1066_vm1, %v1054_v43, 0.0 }
 0x2cd   : > { %v1088_v44 = vsel %vm1066_vm1, %v1057_v55, 0.0 }
 0x2ce   : > { %1089 = vadd.xlane.f32.xlu1 %v1088_v44  ;;  %v1082_v48 = vsel %vm1066_vm1, %v1055_v45, 0.0 }
 0x2d0   : > { %1080 = vadd.xlane.f32.xlu0 %v1079_v47 }
 0x2d2   : > { %1083 = vadd.xlane.f32.xlu1 %v1082_v48 }
 0x2d4   : > { %v1603_v49 = vpop.f32.mrb[40].mxu0 }
 0x2d5   : > { %v1005_v50 = vadd.f32 %v1603_v49, %v2088_v9  ;;  %v996_v51 = vpop.f32.mrb[41].mxu0 }
 0x2d6   : > { %v997_v52 = vadd.f32 %v2088_v9, %v996_v51  ;;  %v1604_v53 = vpop.f32.mrb[42].mxu0 }
 0x2d7   : > { %v1037_v56 = vmax.f32 %v1005_v50, 0.0  ;;  %v1008_v57 = vadd.f32 %v1604_v53, %v2088_v9  ;;  %v999_v58 = vpop.f32.mrb[43].mxu0 }
 0x2d8   : > { %v1035_v59 = vmax.f32 %v997_v52, 0.0  ;;  %v1000_v60 = vadd.f32 %v2088_v9, %v999_v58 }
 0x2d9   : > { %v1038_v61 = vmax.f32 %v1008_v57, 0.0  ;;  %v1060_v62 = vmul.f32 %v2095_v46, %v1037_v56 }
 0x2da   : > { %v1036_v63 = vmax.f32 %v1000_v60, 0.0  ;;  %v1058_v2 = vmul.f32 %v2095_v46, %v1035_v59 }
 0x2db   : > { %v1097_v0 = vsel %vm1066_vm1, %v1060_v62, 0.0  ;;  %v1061_v1 = vmul.f32 %v2095_v46, %v1038_v61 }
 0x2dc   : > { %1098 = vadd.xlane.f32.xlu0 %v1097_v0  ;;  %v1059_v4 = vmul.f32 %v2095_v46, %v1036_v63  ;;  %v1091_v5 = vsel %vm1066_vm1, %v1058_v2, 0.0 }
 0x2dd   : > { %v1100_v3 = vsel %vm1066_vm1, %v1061_v1, 0.0 }
 0x2de   : > { %1101 = vadd.xlane.f32.xlu1 %v1100_v3  ;;  %v1094_v6 = vsel %vm1066_vm1, %v1059_v4, 0.0 }
 0x2e0   : > { %1092 = vadd.xlane.f32.xlu0 %v1091_v5 }
 0x2e2   : > { %1095 = vadd.xlane.f32.xlu1 %v1094_v6 }
 0x2e4   : > { %v1607_v7 = vpop.f32.mrb[44].mxu0 }
 0x2e5   : > { %v1021_v8 = vadd.f32 %v1607_v7, %v2088_v9  ;;  %v1012_v10 = vpop.f32.mrb[45].mxu0 }
 0x2e6   : > { %v1013_v11 = vadd.f32 %v2088_v9, %v1012_v10  ;;  %v1608_v12 = vpop.f32.mrb[46].mxu0 }
 0x2e7   : > { %v1024_v13 = vadd.f32 %v1608_v12, %v2088_v9  ;;  %v1015_v14 = vpop.f32.mrb[47].mxu0  ;;  %v1041_v15 = vmax.f32 %v1021_v8, 0.0 }
 0x2e8   : > { %v1039_v16 = vmax.f32 %v1013_v11, 0.0  ;;  %v1016_v17 = vadd.f32 %v2088_v9, %v1015_v14 }
 0x2e9   : > { %v1042_v18 = vmax.f32 %v1024_v13, 0.0  ;;  %v1064_v23 = vmul.f32 %v2095_v46, %v1041_v15 }
 0x2ea   : > { %v1040_v19 = vmax.f32 %v1016_v17, 0.0  ;;  %v1062_v20 = vmul.f32 %v2095_v46, %v1039_v16 }
 0x2eb   : > { %v1065_v25 = vmul.f32 %v2095_v46, %v1042_v18  ;;  %v1109_v26 = vsel %vm1066_vm1, %v1064_v23, 0.0 }
 0x2ec   : > { %v1103_v21 = vsel %vm1066_vm1, %v1062_v20, 0.0  ;;  %v1063_v22 = vmul.f32 %v2095_v46, %v1040_v19 }
 0x2ed   : > { %1104 = vadd.xlane.f32.xlu0 %v1103_v21  ;;  %v1112_v9 = vsel %vm1066_vm1, %v1065_v25, 0.0 }
 0x2ee   : > { %v1106_v24 = vsel %vm1066_vm1, %v1063_v22, 0.0 }
 0x2ef   : > { %1107 = vadd.xlane.f32.xlu1 %v1106_v24 }
 0x2f1   : > { %1110 = vadd.xlane.f32.xlu0 %v1109_v26 }
 0x2f3   : > { %1113 = vadd.xlane.f32.xlu1 %v1112_v9 }
 0x349   : > { %v1075_v28 = vpop.xlane.xlu1 %1074 }
 0x34a   : > { %v1124_v29 = vadd.f32 %v1476_v27, %v1075_v28  ;;  %v1069_v30 = vpop.xlane.xlu0 %1068 }
 0x34b   : > { %v1122_v31 = vadd.f32 %v1476_v27, %v1069_v30 }
 0x34c   : > { %1141 = vst.msk [vmem:[%s2144_s13 + $0x10] sm:$0xff] %vm1138_vm2, %v1124_v29 }
 0x34d   : > { %1139 = vst.msk [vmem:[%s2144_s13] sm:$0xff] %vm1138_vm2, %v1122_v31  ;;  %v1078_v46 = vpop.xlane.xlu1 %1077 }
 0x34e   : > { %v1125_v32 = vadd.f32 %v1476_v27, %v1078_v46  ;;  %v1072_v33 = vpop.xlane.xlu0 %1071 }
 0x34f   : > { %v1123_v34 = vadd.f32 %v1476_v27, %v1072_v33 }
 0x350   : > { %1142 = vst.msk [vmem:[%s2144_s13 + $0x18] sm:$0xff] %vm1138_vm2, %v1125_v32 }
 0x351   : > { %1140 = vst.msk [vmem:[%s2144_s13 + $0x8] sm:$0xff] %vm1138_vm2, %v1123_v34 }
 0x359   : > { %v1087_v35 = vpop.xlane.xlu0 %1086 }
 0x35a   : > { %v1128_v36 = vadd.f32 %v1476_v27, %v1087_v35 }
 0x35b   : > { %v1090_v37 = vpop.xlane.xlu1 %1089 }
 0x35c   : > { %1145 = vst.msk [vmem:[%s2144_s13 + $0x30] sm:$0xff] %vm1138_vm2, %v1128_v36  ;;  %v1129_v38 = vadd.f32 %v1476_v27, %v1090_v37 }
 0x35d   : > { %v1081_v39 = vpop.xlane.xlu0 %1080 }
 0x35e   : > { %1146 = vst.msk [vmem:[%s2144_s13 + $0x38] sm:$0xff] %vm1138_vm2, %v1129_v38  ;;  %v1126_v40 = vadd.f32 %v1476_v27, %v1081_v39 }
 0x35f   : > { %v1084_v41 = vpop.xlane.xlu1 %1083 }
 0x360   : > { %1143 = vst.msk [vmem:[%s2144_s13 + $0x20] sm:$0xff] %vm1138_vm2, %v1126_v40  ;;  %v1127_v42 = vadd.f32 %v1476_v27, %v1084_v41 }
 0x362   : > { %1144 = vst.msk [vmem:[%s2144_s13 + $0x28] sm:$0xff] %vm1138_vm2, %v1127_v42 }
 0x369   : > { %v1099_v54 = vpop.xlane.xlu0 %1098 }
 0x36a   : > { %v1132_v55 = vadd.f32 %v1476_v27, %v1099_v54 }
 0x36b   : > { %v1102_v43 = vpop.xlane.xlu1 %1101 }
 0x36c   : > { %1149 = vst.msk [vmem:[%s2144_s13 + $0x50] sm:$0xff] %vm1138_vm2, %v1132_v55  ;;  %v1133_v44 = vadd.f32 %v1476_v27, %v1102_v43 }
 0x36d   : > { %v1093_v45 = vpop.xlane.xlu0 %1092 }
 0x36e   : > { %1150 = vst.msk [vmem:[%s2144_s13 + $0x58] sm:$0xff] %vm1138_vm2, %v1133_v44  ;;  %v1130_v47 = vadd.f32 %v1476_v27, %v1093_v45 }
 0x36f   : > { %v1096_v48 = vpop.xlane.xlu1 %1095 }
 0x370   : > { %1147 = vst.msk [vmem:[%s2144_s13 + $0x40] sm:$0xff] %vm1138_vm2, %v1130_v47  ;;  %v1131_v49 = vadd.f32 %v1476_v27, %v1096_v48 }
 0x372   : > { %1148 = vst.msk [vmem:[%s2144_s13 + $0x48] sm:$0xff] %vm1138_vm2, %v1131_v49 }
 0x37a   : > { %v1105_v50 = vpop.xlane.xlu0 %1104 }
 0x37b   : > { %v1134_v51 = vadd.f32 %v1476_v27, %v1105_v50 }
 0x37c   : > { %v1108_v52 = vpop.xlane.xlu1 %1107 }
 0x37d   : > { %1151 = vst.msk [vmem:[%s2144_s13 + $0x60] sm:$0xff] %vm1138_vm2, %v1134_v51  ;;  %v1135_v53 = vadd.f32 %v1476_v27, %v1108_v52  ;;  %1161 = sbr.rel (!%p1895_p4) target bundleno = 949 (0x3b5), region = 60 }
 0x37e   : > { %v1111_v56 = vpop.xlane.xlu0 %1110 }
 0x37f   : > { %1152 = vst.msk [vmem:[%s2144_s13 + $0x68] sm:$0xff] %vm1138_vm2, %v1135_v53  ;;  %v1136_v57 = vadd.f32 %v1476_v27, %v1111_v56 }
 0x380   : > { %v1114_v58 = vpop.xlane.xlu1 %1113 }
 0x381   : > { %1153 = vst.msk [vmem:[%s2144_s13 + $0x70] sm:$0xff] %vm1138_vm2, %v1136_v57  ;;  %v1137_v59 = vadd.f32 %v1476_v27, %v1114_v58 }
 0x383   : > { %1154 = vst.msk [vmem:[%s2144_s13 + $0x78] sm:$0xff] %vm1138_vm2, %v1137_v59 }
 0x384   : > { %s2296_s11 = smov (!%p1164_p8, %s1163_s11), 16 }
 0x385   : > { %s1479_s20 = sshll.u32 %s2296_s11, 7 }
 0x386   : > { %p1482_p9 = scmp.eq.s32.totalorder %s1479_s20, 0 }
 0x387   : > { %s2191_s22 = sshrl.u32 (!%p1482_p9), %s2296_s11, 4 }
 0x388   : > { %1172 = sbr.rel (%p1482_p9) target bundleno = 949 (0x3b5), region = 64  ;;  %p1483_p10 = scmp.le.s32.totalorder (!%p1482_p9), %s2191_s22, 0 }
 0x38f   : > { %1386 = sbr.rel (%p1483_p10) target bundleno = 928 (0x3a0), region = 140  ;;  %s2289_s8 = smov (!%p1483_p10), %s2185_s19 }
 0x390   : > { %s2290_s18 = smov (!%p1483_p10), %s2144_s13  ;;  %s2200_s21 = smov (!%p1483_p10), 0  }
 0x391   : > { %s2202_s24 = smov (!%p1483_p10), 0  }
 0x396 LB: >> { %v1264_v60 = vld [vmem:[%s1790_s18] sm:$0xff]  ;;  %v1266_v61 = vld [vmem:[%s1790_s18 + $0x8] sm:$0xff]  ;;  %v1268_v62 = vld [vmem:[%s1790_s18 + $0x10] sm:$0xff]  ;;  %s1296_s25 = sadd.s32 1, %s1794_s21  ;;  %s1258_s24 = sadd.s32 1, %s1798_s24   ;;  %s1798_s24 = sphi %s2202_s24, %s1258_s24   ;;  %s1794_s21 = sphi %s2200_s21, %s2291_s21   ;;  %s1790_s18 = sphi %s2290_s18, %s1301_s18   ;;  %s1786_s8 = sphi %s2289_s8, %s1302_s8  }
 0x397   : >> { %1265 = vst [vmem:[%s1786_s8] sm:$0xff] %v1264_v60  ;;  %1267 = vst [vmem:[%s1786_s8 + $0x8] sm:$0xff] %v1266_v61  ;;  %v1270_v63 = vld [vmem:[%s1790_s18 + $0x18] sm:$0xff]  ;;  %v1272_v0 = vld [vmem:[%s1790_s18 + $0x20] sm:$0xff]  ;;  %p1297_p11 = scmp.ge.s32.totalorder %s1296_s25, %s2191_s22  ;;  %p1257_p12 = scmp.ge.s32.totalorder %s1258_s24, %s2191_s22 }
 0x398   : >> { %1269 = vst [vmem:[%s1786_s8 + $0x10] sm:$0xff] %v1268_v62  ;;  %v1274_v1 = vld [vmem:[%s1790_s18 + $0x28] sm:$0xff]  ;;  %1271 = vst [vmem:[%s1786_s8 + $0x18] sm:$0xff] %v1270_v63  ;;  %v1276_v2 = vld [vmem:[%s1790_s18 + $0x30] sm:$0xff] }
 0x399   : >> { %1273 = vst [vmem:[%s1786_s8 + $0x20] sm:$0xff] %v1272_v0  ;;  %1275 = vst [vmem:[%s1786_s8 + $0x28] sm:$0xff] %v1274_v1  ;;  %v1278_v3 = vld [vmem:[%s1790_s18 + $0x38] sm:$0xff]  ;;  %v1280_v4 = vld [vmem:[%s1790_s18 + $0x40] sm:$0xff]  ;;  %s2298_s25 = smov (%p1297_p11, %s1296_s25), 0  ;;  %1260 = sbr.rel (!%p1257_p12) target bundleno = 918 (0x396), region = 146 }
 0x39a   : >> { %1277 = vst [vmem:[%s1786_s8 + $0x30] sm:$0xff] %v1276_v2  ;;  %1279 = vst [vmem:[%s1786_s8 + $0x38] sm:$0xff] %v1278_v3  ;;  %v1282_v5 = vld [vmem:[%s1790_s18 + $0x48] sm:$0xff]  ;;  %v1284_v6 = vld [vmem:[%s1790_s18 + $0x50] sm:$0xff]  ;;  %s1484_s26 = sshll.u32 %s2298_s25, 7  ;;  %s2291_s21 = smov %s2298_s25 }
 0x39b   : >> { %1281 = vst [vmem:[%s1786_s8 + $0x40] sm:$0xff] %v1280_v4  ;;  %v1286_v7 = vld [vmem:[%s1790_s18 + $0x58] sm:$0xff]  ;;  %1283 = vst [vmem:[%s1786_s8 + $0x48] sm:$0xff] %v1282_v5  ;;  %v1288_v8 = vld [vmem:[%s1790_s18 + $0x60] sm:$0xff] }
 0x39c   : >> { %1285 = vst [vmem:[%s1786_s8 + $0x50] sm:$0xff] %v1284_v6  ;;  %1287 = vst [vmem:[%s1786_s8 + $0x58] sm:$0xff] %v1286_v7  ;;  %v1290_v10 = vld [vmem:[%s1790_s18 + $0x68] sm:$0xff]  ;;  %v1292_v11 = vld [vmem:[%s1790_s18 + $0x70] sm:$0xff] }
 0x39d   : >> { %1289 = vst [vmem:[%s1786_s8 + $0x60] sm:$0xff] %v1288_v8  ;;  %1291 = vst [vmem:[%s1786_s8 + $0x68] sm:$0xff] %v1290_v10  ;;  %v1294_v12 = vld [vmem:[%s1790_s18 + $0x78] sm:$0xff]  ;;  %s1301_s18 = scalar_lea.vmem %s2144_s13, %s1484_s26 [#allocation3]  }
 0x39e   : >> { %1293 = vst [vmem:[%s1786_s8 + $0x70] sm:$0xff] %v1292_v11  ;;  %1295 = vst [vmem:[%s1786_s8 + $0x78] sm:$0xff] %v1294_v12  ;;  %s1302_s8 = scalar_lea.vmem %s2185_s19, %s1484_s26  }
 0x3a0 PF: > { %s2260_s27 = sand.u32 15, %s2296_s11   ;;  %s1495_s28 = sshll.u32 %s2191_s22, 7 }
 0x3a1   : > { %s1307_s29 = scalar_lea.vmem %s2144_s13, %s1495_s28 [#allocation3]   ;;  %s1309_s30 = scalar_lea.vmem %s2185_s19, %s1495_s28  }
 0x3a2   : > { %p1489_p13 = scmp.le.s32.totalorder %s2260_s27, 0 }
 0x3a3   : > { %s1800_s10 = smov (!%p1489_p13), %s1309_s30   ;;  %s1804_s23 = smov (!%p1489_p13), %s1307_s29  }
 0x3a4   : > { %1400 = sbr.rel (%p1489_p13) target bundleno = 949 (0x3b5), region = 151  ;;  %s1808_s15 = smov (!%p1489_p13), 0  }
 0x3a5   : > { %s1812_s16 = smov (!%p1489_p13), 0  }
 0x3ab LB: >> { %v1319_v13 = vld [vmem:[%s1806_s23] sm:$0xff]  ;;  %s1321_s11 = sadd.s32 1, %s1810_s15  ;;  %s1313_s16 = sadd.s32 1, %s1814_s16   ;;  %s1814_s16 = sphi %s1812_s16, %s1313_s16   ;;  %s1810_s15 = sphi %s1808_s15, %s1809_s15   ;;  %s1806_s23 = sphi %s1804_s23, %s1326_s23   ;;  %s1802_s10 = sphi %s1800_s10, %s1327_s10  }
 0x3ac   : >> { %1320 = vst [vmem:[%s1802_s10] sm:$0xff] %v1319_v13  ;;  %p1322_p0 = scmp.ge.s32.totalorder %s1321_s11, %s2260_s27  ;;  %p1312_p1 = scmp.ge.s32.totalorder %s1313_s16, %s2260_s27 }
 0x3ae   : >> { %s2300_s11 = smov (%p1322_p0, %s1321_s11), 0  ;;  %1315 = sbr.rel (!%p1312_p1) target bundleno = 939 (0x3ab), region = 157 }
 0x3af   : >> { %s1490_s13 = sshll.u32 %s2300_s11, 3  ;;  %s1809_s15 = smov %s2300_s11  }
 0x3b0   : >> { %s1326_s23 = scalar_lea.vmem %s1307_s29, %s1490_s13 [#allocation3]   ;;  %s1327_s10 = scalar_lea.vmem %s1309_s30, %s1490_s13  }
 0x3b5 PF: > { %p18_p2 = scmp.ge.s32.totalorder %s1885_s14, 4   ;;  %s2292_s11 = smov %s1778_s12 }
 0x3b6   : > { %s2293_s12 = smov %s1893_s17  ;;  %s2294_s13 = smov %s1885_s14 }
 0x3b7   :  { %20 = sbr.rel (!%p18_p2) target bundleno = 5 (0x5), region = 168 }

</bundles_post_ra>
